<compile_context>
chip_gen: v7x
topology: tpu7x:2x2x1
jax: 0.10.0
libtpu: 0.0.40
codegen_flags: <defaults>
</compile_context>

<pallas_src>
import jax
import jax.numpy as jnp
from jax.experimental import pallas as pl
from jax.experimental.pallas import tpu as pltpu


# ----------------------------------------------------------------------------
# Kernels
# ----------------------------------------------------------------------------
def _finalize(mask_ref, benc_ref, wz_ref, bz_ref, z_ref, logits_ref, pre):
    # pre: (2H, TM) f32 pre-activation
    h = jnp.tanh(pre + benc_ref[...])                                   # (2H, TM)
    # BernoulliGate Linear(2H -> 1): VPU multiply + sublane (XLU) reduce.
    logits = jnp.sum(h * wz_ref[...], axis=0, keepdims=True) + bz_ref[0, 0]
    # sigmoid(logits) >= 0.5  <=>  logits >= 0  (exact, no EUP transcendental)
    z_ref[...] = (logits >= 0.0).astype(jnp.float32) * mask_ref[...]
    logits_ref[...] = logits


def _make_kernel(fused: bool):
    if fused:
        # Table already contains W_enc @ Embed^T, so one matmul per chunk.
        def kernel(ids_ref, mask_ref, vcol_ref, tab_ref, benc_ref, wz_ref,
                   bz_ref, z_ref, logits_ref, acc_ref):
            k = pl.program_id(1)

            @pl.when(k == 0)
            def _():
                acc_ref[...] = jnp.zeros_like(acc_ref)

            # (KC, 1) == (1, TM)  ->  (KC, TM) one-hot, direct bool->bf16 cast.
            onehot = (vcol_ref[...] == ids_ref[...]).astype(jnp.bfloat16)
            acc_ref[...] += jnp.dot(tab_ref[...], onehot,
                                    preferred_element_type=jnp.float32)  # (2H, TM)

            @pl.when(k == pl.num_programs(1) - 1)
            def _():
                _finalize(mask_ref, benc_ref, wz_ref, bz_ref,
                          z_ref, logits_ref, acc_ref[...])
        return kernel

    def kernel(ids_ref, mask_ref, vcol_ref, tab_ref, wenc_ref, benc_ref, wz_ref,
               bz_ref, z_ref, logits_ref, acc_ref):
        k = pl.program_id(1)

        @pl.when(k == 0)
        def _():
            acc_ref[...] = jnp.zeros_like(acc_ref)

        onehot = (vcol_ref[...] == ids_ref[...]).astype(jnp.bfloat16)
        acc_ref[...] += jnp.dot(tab_ref[...], onehot,
                                preferred_element_type=jnp.float32)      # (E, TM)

        @pl.when(k == pl.num_programs(1) - 1)
        def _():
            pre = jnp.dot(wenc_ref[...], acc_ref[...].astype(jnp.bfloat16),
                          preferred_element_type=jnp.float32)            # (2H, TM)
            _finalize(mask_ref, benc_ref, wz_ref, bz_ref, z_ref, logits_ref, pre)
    return kernel


# ----------------------------------------------------------------------------
# Tiling / VMEM budgeting
# ----------------------------------------------------------------------------
def _vmem_limit_bytes():
    """Generation-aware scoped-VMEM limit (v5e/v6e: 128 MiB phys, v7x: 64 MiB)."""
    cap = 64 * 1024 * 1024
    try:
        cap = int(getattr(pltpu.get_tpu_info(), "vmem_capacity_bytes", cap))
    except Exception:
        pass
    return min(cap * 3 // 4, 100 * 1024 * 1024)


def _pick_token_tile(n_tokens, kc, stream_w, acc_w, h2, e, fused, budget):
    """Largest lane-dense token tile whose accounted VMEM footprint fits."""
    # TM-independent VMEM (pipeline allocates 2 buffers per streamed input).
    fixed = 2 * stream_w * kc * 2              # streamed table chunk (bf16)
    fixed += 2 * kc * 128 * 4                  # vocab-index column (lane-padded)
    fixed += 2 * 2 * h2 * 128 * 4              # b_enc, w_z (lane-padded f32)
    if not fused:
        fixed += 2 * h2 * max(e, 128) * 2      # resident W_enc (bf16)
    # Per-token-lane VMEM.
    per_tm = acc_w * 4                         # f32 accumulator scratch
    per_tm += kc * 8                           # one-hot + compare temporaries
    per_tm += 4 * 2 * 8 * 4                    # ids/mask/z/logits blocks (2 bufs)
    per_tm += h2 * 4                           # finalize pre-activation temp

    tm = (budget - fixed) // max(per_tm, 1)
    tm = max(128, (tm // 128) * 128)
    if tm >= 256:
        tm = (tm // 256) * 256                 # 256-aligned for v6e/v7x MXU passes
    tm = min(tm, 2048)

    n_pad128 = ((n_tokens + 127) // 128) * 128
    if n_pad128 >= 256:
        # Keep >= 2 token tiles so the "parallel" axis can split across
        # v7x's two TensorCores.
        half = ((n_pad128 // 2 + 127) // 128) * 128
        tm = min(tm, max(128, half))
    tm = min(tm, n_pad128)
    return int(tm)


# ----------------------------------------------------------------------------
# Wrapper
# ----------------------------------------------------------------------------
def independent_generator_forward(x, mask, params):
    """x: [B, T] int32 token ids; mask: [B, T] bool.

    Returns (z [B, T] f32 in {0,1}, z_logits [B, T, 1] f32), matching the
    eval-mode PyTorch IndependentGenerator forward.
    """
    B, T = x.shape
    embed_w = params["embed"]          # [V, E]   (nn.Embedding.weight)
    w_enc = params["w_enc"]            # [2H, E]  (Linear weight, out x in)
    b_enc = params["b_enc"]            # [2H]
    w_z = params["w_z"]                # [1, 2H]  (BernoulliGate Linear weight)
    b_z = params["b_z"]                # [1]

    V, E = embed_w.shape
    H2 = w_enc.shape[0]
    N = B * T

    # Fuse the (linear) encoder stand-in into the gather table only when it
    # does not inflate the big V_pad matmul (i.e. 2H <= E).
    fused = H2 <= E

    KC = min(512, pl.cdiv(V, 128) * 128)       # vocab chunk (lane-dim slice)
    V_pad = pl.cdiv(V, KC) * KC
    num_kchunks = V_pad // KC

    vmem_limit = _vmem_limit_bytes()
    stream_w = H2 if fused else E
    acc_w = H2 if fused else E
    TM = _pick_token_tile(N, KC, stream_w, acc_w, H2, E, fused,
                          budget=int(vmem_limit * 0.8))
    num_tiles = pl.cdiv(N, TM)
    N_pad = num_tiles * TM

    # Lane-dense token streams: [1, N_pad], streamed in (1, TM) blocks.
    ids = jnp.pad(x.reshape(-1).astype(jnp.int32), (0, N_pad - N)).reshape(1, N_pad)
    mask_f = jnp.pad(mask.reshape(-1).astype(jnp.float32),
                     (0, N_pad - N)).reshape(1, N_pad)
    vcol = jnp.arange(V_pad, dtype=jnp.int32).reshape(V_pad, 1)

    benc = b_enc.reshape(H2, 1).astype(jnp.float32)
    wz = w_z.reshape(H2, 1).astype(jnp.float32)
    bz = b_z.reshape(1, 1).astype(jnp.float32)

    if fused:
        # pre = W_enc @ Embed[x]^T == (W_enc @ Embed^T)[:, x]
        fused_t = jnp.dot(w_enc, embed_w.T)                               # (2H, V) f32
        fused_t = jnp.pad(fused_t, ((0, 0), (0, V_pad - V))).astype(jnp.bfloat16)
        tables = (fused_t,)
        table_specs = [pl.BlockSpec((H2, KC), lambda i, k: (0, k))]       # streamed
    else:
        table_t = jnp.pad(embed_w, ((0, V_pad - V), (0, 0))).T.astype(jnp.bfloat16)
        wenc = w_enc.astype(jnp.bfloat16)
        tables = (table_t, wenc)
        table_specs = [pl.BlockSpec((E, KC), lambda i, k: (0, k)),        # streamed
                       pl.BlockSpec((H2, E), lambda i, k: (0, 0))]        # resident

    z_flat, logits_flat = pl.pallas_call(
        _make_kernel(fused),
        out_shape=(
            jax.ShapeDtypeStruct((1, N_pad), jnp.float32),   # z
            jax.ShapeDtypeStruct((1, N_pad), jnp.float32),   # z_logits
        ),
        grid_spec=pltpu.PrefetchScalarGridSpec(
            num_scalar_prefetch=0,
            grid=(num_tiles, num_kchunks),                   # (token tiles, vocab chunks)
            in_specs=[
                pl.BlockSpec((1, TM), lambda i, k: (0, i)),          # token ids
                pl.BlockSpec((1, TM), lambda i, k: (0, i)),          # mask
                pl.BlockSpec((KC, 1), lambda i, k: (k, 0)),          # vocab index col
                *table_specs,
                pl.BlockSpec((H2, 1), lambda i, k: (0, 0)),          # b_enc
                pl.BlockSpec((H2, 1), lambda i, k: (0, 0)),          # w_z
                pl.BlockSpec(memory_space=pltpu.MemorySpace.SMEM),   # b_z scalar
            ],
            out_specs=[
                pl.BlockSpec((1, TM), lambda i, k: (0, i)),
                pl.BlockSpec((1, TM), lambda i, k: (0, i)),
            ],
            scratch_shapes=[pltpu.VMEM((acc_w, TM), jnp.float32)],
        ),
        compiler_params=pltpu.CompilerParams(
            dimension_semantics=("parallel", "arbitrary"),
            vmem_limit_bytes=vmem_limit,
        ),
    )(ids, mask_f, vcol, *tables, benc, wz, bz)

    z = z_flat[0, :N].reshape(B, T)
    z_logits = logits_flat[0, :N].reshape(B, T, 1)
    return z, z_logits


# ----------------------------------------------------------------------------
# Pure-JAX f32 reference (eval-mode forward) + params
# ----------------------------------------------------------------------------
def reference_forward(x, mask, params):
    emb = params["embed"][x]                                             # (B, T, E)
    h = jnp.tanh(emb @ params["w_enc"].T + params["b_enc"])              # (B, T, 2H)
    logits = h @ params["w_z"].T + params["b_z"]                         # (B, T, 1)
    z = (jax.nn.sigmoid(logits) >= 0.5).astype(jnp.float32)[..., 0]
    z = jnp.where(mask, z, 0.0)
    return z, logits


def init_params(key, vocab_size, emb_size, hidden_size):
    enc_size = 2 * hidden_size
    k0, k1, k2 = jax.random.split(key, 3)
    return {
        "embed": 0.1 * jax.random.normal(k0, (vocab_size, emb_size), jnp.float32),
        "w_enc": 0.1 * jax.random.normal(k1, (enc_size, emb_size), jnp.float32),
        "b_enc": jnp.zeros((enc_size,), jnp.float32),
        "w_z":   0.1 * jax.random.normal(k2, (1, enc_size), jnp.float32),
        "b_z":   jnp.zeros((1,), jnp.float32),
    }


if __name__ == "__main__":
    key = jax.random.PRNGKey(0)

    def run_case(case_key, B, T, vocab_size, emb_size, hidden_size, seq_lens):
        pk, xk = jax.random.split(case_key)
        params = init_params(pk, vocab_size, emb_size, hidden_size)
        x = jax.random.randint(xk, (B, T), 0, vocab_size, dtype=jnp.int32)
        lengths = jnp.array(seq_lens, dtype=jnp.int32)
        mask = jnp.arange(T)[None, :] < lengths[:, None]                 # [B, T] bool

        z, z_logits = independent_generator_forward(x, mask, params)
        jax.block_until_ready((z, z_logits))
        z_ref, logits_ref = reference_forward(x, mask, params)

        assert z.shape == (B, T) and z.dtype == jnp.float32
        assert z_logits.shape == (B, T, 1) and z_logits.dtype == jnp.float32
        # z must be 0/1, zero outside the mask, and z == (logits >= 0) inside.
        assert bool(jnp.all((z == 0.0) | (z == 1.0)))
        assert bool(jnp.all(jnp.where(mask, True, z == 0.0)))
        assert bool(jnp.all(jnp.where(
            mask, z == (z_logits[..., 0] >= 0.0).astype(jnp.float32), True)))
        # Logits match the f32 reference up to bf16 weight quantization.
        assert bool(jnp.allclose(z_logits, logits_ref, atol=5e-2, rtol=5e-2))
        # z may only differ from the reference where the logit is near zero.
        confident = jnp.abs(logits_ref[..., 0]) > 5e-2
        assert bool(jnp.all(jnp.where(mask & confident, z == z_ref, True)))

    k1, k2 = jax.random.split(key)
    # Fused path (2H <= E): pre-fused W_enc @ Embed^T table.
    run_case(k1, B=2, T=8, vocab_size=50, emb_size=32, hidden_size=16,
             seq_lens=[8, 5])
    # Unfused path (2H > E): separate gather + encoder matmuls.
    run_case(k2, B=2, T=8, vocab_size=50, emb_size=32, hidden_size=24,
             seq_lens=[8, 3])

    print("KERNEL_OK")
</pallas_src>

<mosaic_0001>
module attributes {stable_mosaic.version = 11 : i64} {
  func.func @kernel(%arg0: i32, %arg1: i32, %arg2: memref<1x128xi32, #tpu.memory_space<vmem>>, %arg3: memref<1x128xf32, #tpu.memory_space<vmem>>, %arg4: memref<128x1xi32, #tpu.memory_space<vmem>>, %arg5: memref<32x128xbf16, #tpu.memory_space<vmem>>, %arg6: memref<32x1xf32, #tpu.memory_space<vmem>>, %arg7: memref<32x1xf32, #tpu.memory_space<vmem>>, %arg8: memref<1x1xf32, #tpu.memory_space<smem>>, %arg9: memref<1x128xf32, #tpu.memory_space<vmem>>, %arg10: memref<1x128xf32, #tpu.memory_space<vmem>>, %arg11: memref<32x128xf32, #tpu.memory_space<vmem>>) attributes {dimension_semantics = [#tpu.dimension_semantics<parallel>, #tpu.dimension_semantics<arbitrary>], iteration_bounds = array<i64: 1, 1>, scalar_prefetch = 0 : i64, scratch_operands = 1 : i64, tpu.core_type = #tpu.core_type<tc>, window_params = [{transform_indices = @transform_0, window_bounds = array<i64: 1, 128>}, {transform_indices = @transform_1, window_bounds = array<i64: 1, 128>}, {transform_indices = @transform_2, window_bounds = array<i64: 128, 1>}, {transform_indices = @transform_3, window_bounds = array<i64: 32, 128>}, {pipeline_mode = #tpu.pipeline_mode<synchronous>, transform_indices = @transform_4, window_bounds = array<i64: 32, 1>}, {pipeline_mode = #tpu.pipeline_mode<synchronous>, transform_indices = @transform_5, window_bounds = array<i64: 32, 1>}, {transform_indices = @transform_6, window_bounds = array<i64: 1, 1>}, {transform_indices = @transform_7, window_bounds = array<i64: 1, 128>}, {transform_indices = @transform_8, window_bounds = array<i64: 1, 128>}]} {
    %c0_i32 = arith.constant 0 : i32
    %0 = arith.cmpi eq, %arg1, %c0_i32 : i32
    %1 = arith.extui %0 : i1 to i32
    %c0_i32_0 = arith.constant 0 : i32
    %2 = arith.cmpi ne, %1, %c0_i32_0 : i32
    scf.if %2 {
      %cst_12 = arith.constant 0.000000e+00 : f32
      %19 = vector.broadcast %cst_12 : f32 to vector<32x128xf32>
      %c0_13 = arith.constant 0 : index
      %c0_14 = arith.constant 0 : index
      %20 = vector.load %arg11[%c0_13, %c0_14] : memref<32x128xf32, #tpu.memory_space<vmem>>, vector<32x128xf32>
      tpu.vector_store %arg11[%c0_13, %c0_14], %19 {strides = array<i32>} : memref<32x128xf32, #tpu.memory_space<vmem>>, vector<32x128xf32>,
    } else {
    }
    %c0 = arith.constant 0 : index
    %c0_1 = arith.constant 0 : index
    %3 = vector.load %arg4[%c0, %c0_1] : memref<128x1xi32, #tpu.memory_space<vmem>>, vector<128x1xi32>
    %c0_2 = arith.constant 0 : index
    %c0_3 = arith.constant 0 : index
    %4 = vector.load %arg2[%c0_2, %c0_3] : memref<1x128xi32, #tpu.memory_space<vmem>>, vector<1x128xi32>
    %5 = vector.broadcast %3 : vector<128x1xi32> to vector<128x128xi32>
    %6 = vector.broadcast %4 : vector<1x128xi32> to vector<128x128xi32>
    %7 = arith.cmpi eq, %5, %6 : vector<128x128xi32>
    %8 = arith.extui %7 : vector<128x128xi1> to vector<128x128xi32>
    %9 = arith.sitofp %8 : vector<128x128xi32> to vector<128x128xf32>
    %10 = arith.truncf %9 : vector<128x128xf32> to vector<128x128xbf16>
    %c0_4 = arith.constant 0 : index
    %c0_5 = arith.constant 0 : index
    %11 = vector.load %arg11[%c0_4, %c0_5] : memref<32x128xf32, #tpu.memory_space<vmem>>, vector<32x128xf32>
    %c0_6 = arith.constant 0 : index
    %c0_7 = arith.constant 0 : index
    %12 = vector.load %arg5[%c0_6, %c0_7] : memref<32x128xbf16, #tpu.memory_space<vmem>>, vector<32x128xbf16>
    %cst = arith.constant dense<0.000000e+00> : vector<32x128xf32>
    %13 = tpu.matmul %12, %10, %cst {dimension_numbers = #tpu.dot_dimension_numbers<[1], [0], [0], [1], [0, 0, 1, 1], [], []>} : vector<32x128xbf16>, vector<128x128xbf16>, vector<32x128xf32> -> vector<32x128xf32>
    %14 = arith.addf %11, %13 : vector<32x128xf32>
    %c0_8 = arith.constant 0 : index
    %c0_9 = arith.constant 0 : index
    %15 = vector.load %arg11[%c0_8, %c0_9] : memref<32x128xf32, #tpu.memory_space<vmem>>, vector<32x128xf32>
    tpu.vector_store %arg11[%c0_8, %c0_9], %14 {strides = array<i32>} : memref<32x128xf32, #tpu.memory_space<vmem>>, vector<32x128xf32>,
    %c0_i32_10 = arith.constant 0 : i32
    %16 = arith.cmpi eq, %arg1, %c0_i32_10 : i32
    %17 = arith.extui %16 : i1 to i32
    %c0_i32_11 = arith.constant 0 : i32
    %18 = arith.cmpi ne, %17, %c0_i32_11 : i32
    scf.if %18 {
      %c0_12 = arith.constant 0 : index
      %c0_13 = arith.constant 0 : index
      %19 = vector.load %arg11[%c0_12, %c0_13] : memref<32x128xf32, #tpu.memory_space<vmem>>, vector<32x128xf32>
      %c0_14 = arith.constant 0 : index
      %c0_15 = arith.constant 0 : index
      %20 = vector.load %arg6[%c0_14, %c0_15] : memref<32x1xf32, #tpu.memory_space<vmem>>, vector<32x1xf32>
      %21 = vector.broadcast %20 : vector<32x1xf32> to vector<32x128xf32>
      %22 = arith.addf %19, %21 : vector<32x128xf32>
      %23 = math.tanh %22 : vector<32x128xf32>
      %c0_16 = arith.constant 0 : index
      %c0_17 = arith.constant 0 : index
      %24 = vector.load %arg7[%c0_16, %c0_17] : memref<32x1xf32, #tpu.memory_space<vmem>>, vector<32x1xf32>
      %25 = vector.broadcast %24 : vector<32x1xf32> to vector<32x128xf32>
      %26 = arith.mulf %23, %25 : vector<32x128xf32>
      %cst_18 = arith.constant dense<0.000000e+00> : vector<128xf32>
      %27 = vector.multi_reduction <add>, %26, %cst_18 [0] : vector<32x128xf32> to vector<128xf32>
      %28 = vector.shape_cast %27 : vector<128xf32> to vector<1x128xf32>
      %c0_19 = arith.constant 0 : index
      %c0_20 = arith.constant 0 : index
      %29 = memref.load %arg8[%c0_19, %c0_20] : memref<1x1xf32, #tpu.memory_space<smem>>
      %30 = vector.broadcast %29 : f32 to vector<1x128xf32>
      %31 = arith.addf %28, %30 : vector<1x128xf32>
      %cst_21 = arith.constant 0.000000e+00 : f32
      %32 = vector.broadcast %cst_21 : f32 to vector<1x128xf32>
      %33 = arith.cmpf oge, %31, %32 : vector<1x128xf32>
      %34 = arith.extui %33 : vector<1x128xi1> to vector<1x128xi32>
      %35 = arith.sitofp %34 : vector<1x128xi32> to vector<1x128xf32>
      %c0_22 = arith.constant 0 : index
      %c0_23 = arith.constant 0 : index
      %36 = vector.load %arg3[%c0_22, %c0_23] : memref<1x128xf32, #tpu.memory_space<vmem>>, vector<1x128xf32>
      %37 = arith.mulf %35, %36 : vector<1x128xf32>
      %c0_24 = arith.constant 0 : index
      %c0_25 = arith.constant 0 : index
      %38 = vector.load %arg9[%c0_24, %c0_25] : memref<1x128xf32, #tpu.memory_space<vmem>>, vector<1x128xf32>
      tpu.vector_store %arg9[%c0_24, %c0_25], %37 {strides = array<i32>} : memref<1x128xf32, #tpu.memory_space<vmem>>, vector<1x128xf32>,
      %c0_26 = arith.constant 0 : index
      %c0_27 = arith.constant 0 : index
      %39 = vector.load %arg10[%c0_26, %c0_27] : memref<1x128xf32, #tpu.memory_space<vmem>>, vector<1x128xf32>
      tpu.vector_store %arg10[%c0_26, %c0_27], %31 {strides = array<i32>} : memref<1x128xf32, #tpu.memory_space<vmem>>, vector<1x128xf32>,
    } else {
    }
    return
  }
  func.func @transform_0(%arg0: i32, %arg1: i32) -> (i32, i32) {
    %c0_i32 = arith.constant 0 : i32
    %c0_i32_0 = arith.constant 0 : i32
    return %c0_i32, %arg0 : i32, i32
  }
  func.func @transform_1(%arg0: i32, %arg1: i32) -> (i32, i32) {
    %c0_i32 = arith.constant 0 : i32
    %c0_i32_0 = arith.constant 0 : i32
    return %c0_i32, %arg0 : i32, i32
  }
  func.func @transform_2(%arg0: i32, %arg1: i32) -> (i32, i32) {
    %c0_i32 = arith.constant 0 : i32
    %c0_i32_0 = arith.constant 0 : i32
    return %arg1, %c0_i32 : i32, i32
  }
  func.func @transform_3(%arg0: i32, %arg1: i32) -> (i32, i32) {
    %c0_i32 = arith.constant 0 : i32
    %c0_i32_0 = arith.constant 0 : i32
    return %c0_i32, %arg1 : i32, i32
  }
  func.func @transform_4(%arg0: i32, %arg1: i32) -> (i32, i32) {
    %c0_i32 = arith.constant 0 : i32
    %c0_i32_0 = arith.constant 0 : i32
    %c0_i32_1 = arith.constant 0 : i32
    return %c0_i32, %c0_i32_0 : i32, i32
  }
  func.func @transform_5(%arg0: i32, %arg1: i32) -> (i32, i32) {
    %c0_i32 = arith.constant 0 : i32
    %c0_i32_0 = arith.constant 0 : i32
    %c0_i32_1 = arith.constant 0 : i32
    return %c0_i32, %c0_i32_0 : i32, i32
  }
  func.func @transform_6(%arg0: i32, %arg1: i32) -> (i32, i32) {
    %c0_i32 = arith.constant 0 : i32
    %c0_i32_0 = arith.constant 0 : i32
    %c0_i32_1 = arith.constant 0 : i32
    return %c0_i32, %c0_i32_0 : i32, i32
  }
  func.func @transform_7(%arg0: i32, %arg1: i32) -> (i32, i32) {
    %c0_i32 = arith.constant 0 : i32
    %c0_i32_0 = arith.constant 0 : i32
    return %c0_i32, %arg0 : i32, i32
  }
  func.func @transform_8(%arg0: i32, %arg1: i32) -> (i32, i32) {
    %c0_i32 = arith.constant 0 : i32
    %c0_i32_0 = arith.constant 0 : i32
    return %c0_i32, %arg0 : i32, i32
  }
}

</mosaic_0001>

<bundles_post_ra>
// kernel: tpu_custom_call.1
= control target key start
LH: loop header
LB: loop body
LE: loop exit
PB: predicated region body
PF: predicated region fallthrough
CT: control target
= control target key end

     0   :  { %15 = vsyncpa [#allocation5], 0  ;;  %v487_v2 = vmov 0   ;;  %s648_s0 = inlined_call_operand.vmem [shape: s32[1,128], index: 0, kind: input, shape index: {}]   ;;  %s649_s1 = inlined_call_operand.vmem [shape: f32[1,128], index: 1, kind: input, shape index: {}]   ;;  %s650_s2 = inlined_call_operand.vmem [shape: s32[128,1], index: 2, kind: input, shape index: {}]   ;;  %s651_s3 = inlined_call_operand.vmem [shape: bf16[32,128], index: 3, kind: input, shape index: {}]   ;;  %s652_s4 = inlined_call_operand.vmem [shape: f32[32,1], index: 4, kind: input, shape index: {}]   ;;  %s653_s5 = inlined_call_operand.vmem [shape: f32[32,1], index: 5, kind: input, shape index: {}]   ;;  %s654_s6 = inlined_call_operand.<no memory space> [shape: f32[1,1], index: 6, kind: input, shape index: {}]   ;;  %s655_s7 = inlined_call_operand.hbm [shape: f32[1,128], index: 7, kind: output, shape index: {0}]   ;;  %s656_s8 = inlined_call_operand.hbm [shape: f32[1,128], index: 8, kind: output, shape index: {1}]  }
   0x1   :  { %v42_v0 = vld [vmem:[%s650_s2 + $0x10] sm:$0xff]  ;;  %v40_v1 = vld [vmem:[%s650_s2] sm:$0xff]  ;;  %428 = vset.pattern.permute.xlu1 %v487_v2  ;;  %427 = vset.pattern.permute.xlu0 %v487_v2  ;;  %v43_v3 = vld [vmem:[%s650_s2 + $0x18] sm:$0xff] }
   0x2   :  { %64 = vperm.xlu1 %428, %v42_v0   ;;  %58 = vperm.xlu0 %427, %v40_v1   ;;  %v41_v4 = vld [vmem:[%s650_s2 + $0x8] sm:$0xff]  ;;  %v44_v6 = vld [vmem:[%s650_s2 + $0x20] sm:$0xff] }
   0x3   :  { %v45_v5 = vld [vmem:[%s650_s2 + $0x28] sm:$0xff] }
   0x6   :  { %67 = vperm.xlu1 %428, %v43_v3   ;;  %61 = vperm.xlu0 %427, %v41_v4  }
   0xa   :  { %73 = vperm.xlu1 %428, %v45_v5   ;;  %70 = vperm.xlu0 %427, %v44_v6  }
   0xb   :  { %16 = vsyncpa [#allocation7], 0  ;;  %v47_v7 = vld [vmem:[%s650_s2 + $0x38] sm:$0xff]  ;;  %v46_v8 = vld [vmem:[%s650_s2 + $0x30] sm:$0xff]  ;;  %v488_v31 = vmov 1.0|1.0  }
   0xc   :  { %v49_v9 = vld [vmem:[%s650_s2 + $0x48] sm:$0xff]  ;;  %v48_v10 = vld [vmem:[%s650_s2 + $0x40] sm:$0xff]  ;;  %v51_v11 = vld [vmem:[%s650_s2 + $0x58] sm:$0xff]  ;;  %s489_s12 = smov [#allocation6]   ;;  %s490_s16 = smov [#allocation4]  }
   0xd   :  { %v50_v12 = vld [vmem:[%s650_s2 + $0x50] sm:$0xff]  ;;  %v53_v13 = vld [vmem:[%s650_s2 + $0x68] sm:$0xff]  ;;  %v52_v14 = vld [vmem:[%s650_s2 + $0x60] sm:$0xff]  ;;  %s344_s13 = sshll.u32 %s489_s12, 4  ;;  %s334_s17 = sshll.u32 %s490_s16, 4  ;;  %s345_s13 = int_to_ptr.vmem [resolvable:$true] %s344_s13  ;;  %s335_s17 = int_to_ptr.vmem [resolvable:$true] %s334_s17 }
   0xe   :  { %79 = vperm.xlu1 %428, %v47_v7   ;;  %76 = vperm.xlu0 %427, %v46_v8   ;;  %v55_v15 = vld [vmem:[%s650_s2 + $0x78] sm:$0xff]  ;;  %v54_v16 = vld [vmem:[%s650_s2 + $0x70] sm:$0xff]  ;;  %v250_v17 = vld [vmem:[%s652_s4 + $0x8] sm:$0xff]  ;;  %s439_s18 = scalar_lea.vmem %s345_s13, 16  ;;  %s443_s19 = scalar_lea.vmem %s345_s13, 32 }
   0xf   :  { %v249_v18 = vld [vmem:[%s652_s4] sm:$0xff]  ;;  %v252_v19 = vld [vmem:[%s652_s4 + $0x18] sm:$0xff]  ;;  %v251_v20 = vld [vmem:[%s652_s4 + $0x10] sm:$0xff]  ;;  %p440_p0 = scmp.ne.s32.totalorder %s345_s13, %s439_s18  ;;  %p444_p1 = scmp.lt.s32.totalorder %s345_s13, %s345_s13 }
  0x10   :  { %v429_v21 = vld [vmem:[%s651_s3] sm:$0xff]   ;;  %v282_v22 = vld [vmem:[%s653_s5 + $0x8] sm:$0xff]  ;;  %v284_v24 = vld [vmem:[%s653_s5 + $0x18] sm:$0xff]  ;;  %p445_p2 = scmp.lt.s32.totalorder %s443_s19, %s439_s18 }
  0x11   :  { %v281_v23 = vld [vmem:[%s653_s5] sm:$0xff]  ;;  %418 = vmatprep.mubr.bf16.mxu0 %v429_v21  ;;  %v283_v25 = vld [vmem:[%s653_s5 + $0x10] sm:$0xff]  ;;  %v430_v44 = vld [vmem:[%s651_s3 + $0x8] sm:$0xff]  }
  0x12   :  { %85 = vperm.xlu1 %428, %v49_v9   ;;  %82 = vperm.xlu0 %427, %v48_v10   ;;  %v356_v28 = vld [vmem:[%s648_s0] ss:$0 sm:$0xff]  ;;  %p446_p3 = por %p445_p2, %p444_p1 }
  0x14   :  { %p447_p4 = pnand %p446_p3, %p440_p0 }
  0x16   :  { %91 = vperm.xlu1 %428, %v51_v11   ;;  %88 = vperm.xlu0 %427, %v50_v12  }
  0x1a   :  { %97 = vperm.xlu1 %428, %v53_v13   ;;  %94 = vperm.xlu0 %427, %v52_v14   ;;  %v319_v13 = vstv %s654_s6 }
  0x1e   :  { %103 = vperm.xlu1 %428, %v55_v15   ;;  %100 = vperm.xlu0 %427, %v54_v16   ;;  %v324_v16 = vld [vmem:[%s649_s1] sm:$0x1] }
  0x22   :  { %260 = vperm.xlu1 %428, %v250_v17   ;;  %255 = vperm.xlu0 %427, %v249_v18   ;;  %v491_v17 = vmov 0.0  }
  0x26   :  { %270 = vperm.xlu1 %428, %v252_v19   ;;  %265 = vperm.xlu0 %427, %v251_v20  }
  0x2a   :  { %292 = vperm.xlu1 %428, %v282_v22   ;;  %287 = vperm.xlu0 %427, %v281_v23  }
  0x2e   :  { %302 = vperm.xlu1 %428, %v284_v24   ;;  %297 = vperm.xlu0 %427, %v283_v25  }
  0x81   :  { %v65_v26 = vpop.permute.xlu1 %64  ;;  %v59_v27 = vpop.permute.xlu0 %58 }
  0x82   :  { %vm111_vm1 = vcmp.eq.s32.totalorder %v65_v26, %v356_v28  ;;  %vm109_vm2 = vcmp.eq.s32.totalorder %v59_v27, %v356_v28 }
  0x85   :  { %v68_v29 = vpop.permute.xlu1 %67  ;;  %v62_v30 = vpop.permute.xlu0 %61 }
  0x86   :  { %vm110_vm0 = vcmp.eq.s32.totalorder %v62_v30, %v356_v28  ;;  %vm112_vm3 = vcmp.eq.s32.totalorder %v68_v29, %v356_v28 }
  0x87   :  { %vm375_vm4 = vmpackc.low %vm110_vm0, %vm109_vm2 }
  0x88   :  { %402 = vmatprep.subr.msk.bf16.mxu0 %vm375_vm4, %v488_v31  ;;  %vm377_vm5 = vmpackc.low %vm112_vm3, %vm111_vm1 }
  0x89   :  { %v74_v32 = vpop.permute.xlu1 %73  ;;  %v71_v33 = vpop.permute.xlu0 %70  ;;  %403 = vmatpush3.bf16.msk.msra.mxu0 %vm375_vm4, %v488_v31 }
  0x8a   :  { %vm114_vm6 = vcmp.eq.s32.totalorder %v74_v32, %v356_v28  ;;  %vm113_vm7 = vcmp.eq.s32.totalorder %v71_v33, %v356_v28  ;;  %404 = vmatprep.subr.msk.bf16.mxu0 %vm377_vm5, %v488_v31 }
  0x8b   :  { %vm379_vm8 = vmpackc.low %vm114_vm6, %vm113_vm7 }
  0x8d   :  { %v80_v34 = vpop.permute.xlu1 %79  ;;  %v77_v35 = vpop.permute.xlu0 %76  ;;  %405 = vmatpush3.bf16.msk.msra.mxu0 %vm377_vm5, %v488_v31 }
  0x8e   :  { %vm116_vm9 = vcmp.eq.s32.totalorder %v80_v34, %v356_v28  ;;  %vm115_vm10 = vcmp.eq.s32.totalorder %v77_v35, %v356_v28  ;;  %406 = vmatprep.subr.msk.bf16.mxu0 %vm379_vm8, %v488_v31 }
  0x8f   :  { %vm381_vm11 = vmpackc.low %vm116_vm9, %vm115_vm10 }
  0x91   :  { %v86_v36 = vpop.permute.xlu1 %85  ;;  %v83_v37 = vpop.permute.xlu0 %82  ;;  %407 = vmatpush3.bf16.msk.msra.mxu0 %vm379_vm8, %v488_v31 }
  0x92   :  { %vm118_vm12 = vcmp.eq.s32.totalorder %v86_v36, %v356_v28  ;;  %vm117_vm13 = vcmp.eq.s32.totalorder %v83_v37, %v356_v28  ;;  %408 = vmatprep.subr.msk.bf16.mxu0 %vm381_vm11, %v488_v31 }
  0x93   :  { %vm383_vm14 = vmpackc.low %vm118_vm12, %vm117_vm13 }
  0x95   :  { %v92_v38 = vpop.permute.xlu1 %91  ;;  %v89_v39 = vpop.permute.xlu0 %88  ;;  %409 = vmatpush3.bf16.msk.msra.mxu0 %vm381_vm11, %v488_v31 }
  0x96   :  { %vm120_vm15 = vcmp.eq.s32.totalorder %v92_v38, %v356_v28  ;;  %vm119_vm0 = vcmp.eq.s32.totalorder %v89_v39, %v356_v28  ;;  %410 = vmatprep.subr.msk.bf16.mxu0 %vm383_vm14, %v488_v31 }
  0x97   :  { %vm385_vm1 = vmpackc.low %vm120_vm15, %vm119_vm0 }
  0x99   :  { %v98_v40 = vpop.permute.xlu1 %97  ;;  %v95_v41 = vpop.permute.xlu0 %94  ;;  %411 = vmatpush3.bf16.msk.msra.mxu0 %vm383_vm14, %v488_v31 }
  0x9a   :  { %vm122_vm2 = vcmp.eq.s32.totalorder %v98_v40, %v356_v28  ;;  %vm121_vm3 = vcmp.eq.s32.totalorder %v95_v41, %v356_v28  ;;  %412 = vmatprep.subr.msk.bf16.mxu0 %vm385_vm1, %v488_v31 }
  0x9b   :  { %vm387_vm4 = vmpackc.low %vm122_vm2, %vm121_vm3 }
  0x9d   :  { %v104_v42 = vpop.permute.xlu1 %103  ;;  %v101_v43 = vpop.permute.xlu0 %100  ;;  %413 = vmatpush3.bf16.msk.msra.mxu0 %vm385_vm1, %v488_v31 }
  0x9e   :  { %vm124_vm5 = vcmp.eq.s32.totalorder %v104_v42, %v356_v28  ;;  %vm123_vm6 = vcmp.eq.s32.totalorder %v101_v43, %v356_v28  ;;  %414 = vmatprep.subr.msk.bf16.mxu0 %vm387_vm4, %v488_v31 }
  0x9f   :  { %vm389_vm7 = vmpackc.low %vm124_vm5, %vm123_vm6 }
  0xa1   :  { %415 = vmatpush3.bf16.msk.msra.mxu0 %vm387_vm4, %v488_v31  ;;  %v256_v45 = vpop.permute.xlu0 %255  ;;  %v261_v46 = vpop.permute.xlu1 %260 }
  0xa2   :  { %416 = vmatprep.subr.msk.bf16.mxu0 %vm389_vm7, %v488_v31 }
  0xa5   :  { %417 = vmatpush3.bf16.msk.msra.mxu0 %vm389_vm7, %v488_v31  ;;  %v266_v47 = vpop.permute.xlu0 %265  ;;  %v271_v53 = vpop.permute.xlu1 %270 }
  0xa8   :  { %419 = vmatmul.mubr.bf16.vlgmr.msra.gmra.mrb[0].mxu0 %v430_v44 }
  0xa9   :  { %v288_v57 = vpop.permute.xlu0 %287  ;;  %v293_v59 = vpop.permute.xlu1 %292 }
  0xad   :  { %v298_v1 = vpop.permute.xlu0 %297  ;;  %v303_v4 = vpop.permute.xlu1 %302 }
 0x17b   :  { %v420_v48 = vpop.f32.mrb[0].mxu0 }
 0x17c   :  { %v275_v49 = vadd.f32 %v420_v48, %v266_v47  ;;  %v219_v50 = vpop.f32.mrb[1].mxu0 }
 0x17d   :  { %v273_v51 = vadd.f32 %v256_v45, %v219_v50  ;;  %v421_v52 = vpop.f32.mrb[2].mxu0 }
 0x17e   :  { %v222_v54 = vpop.f32.mrb[3].mxu0  ;;  %v276_v55 = vadd.f32 %v421_v52, %v271_v53 }
 0x17f   :  { %431 = vtanh.f32 %v273_v51  ;;  %v274_v56 = vadd.f32 %v261_v46, %v222_v54 }
 0x180   :  { %433 = vtanh.f32 %v275_v49 }
 0x181   :  { %435 = vtanh.f32 %v274_v56 }
 0x182   :  { %437 = vtanh.f32 %v276_v55 }
 0x189   :  { %v432_v58 = vpop.eup %431 }
 0x18a   :  { %v434_v60 = vpop.eup %433  ;;  %v305_v62 = vmul.f32 %v432_v58, %v288_v57 }
 0x18b   :  { %v436_v61 = vpop.eup %435  ;;  %v307_v2 = vmul.f32 %v434_v60, %v298_v1 }
 0x18c   :  { %v306_v63 = vmul.f32 %v436_v61, %v293_v59  ;;  %v438_v0 = vpop.eup %437 }
 0x18d   :  { %v308_v5 = vmul.f32 %v438_v0, %v303_v4 }
 0x18e   :  { %v309_v3 = vadd.f32 %v306_v63, %v305_v62 }
 0x190   :  { %v310_v6 = vadd.f32 %v309_v3, %v307_v2 }
 0x192   :  { %v311_v7 = vadd.f32 %v310_v6, %v308_v5 }
 0x194   :  { %v312_v8 = vrot.slane %v311_v7, 4 }
 0x196   :  { %v313_v9 = vadd.f32 %v312_v8, %v311_v7 }
 0x198   :  { %v314_v10 = vrot.slane %v313_v9, 2 }
 0x19a   :  { %v315_v11 = vadd.f32 %v314_v10, %v313_v9 }
 0x19c   :  { %v316_v12 = vrot.slane %v315_v11, 1 }
 0x19e   :  { %v317_v14 = vadd.f32 %v316_v12, %v315_v11 }
 0x1a0   :  { %v320_v15 = vadd.f32 %v319_v13, %v317_v14 }
 0x1a2   :  { %vm321_vm8 = vcmp.ge.f32.partialorder %v320_v15, 0.0  ;;  %327 = vst [vmem:[#allocation6] sm:$0x1] %v320_v15 }
 0x1a3   :  { %v391_v18 = vsel %vm321_vm8, 1.0, %v491_v17 }
 0x1a4   :  { %450 = shalt.err (!%p447_p4)
}
 0x1a5   :  { %s451_s21 = scalar_lea.hbm %s656_s8, 16 }
 0x1a6   :  { %p452_p5 = scmp.ne.s32.totalorder %s656_s8, %s451_s21  ;;  %p455_p6 = scmp.lt.u32.totalorder %s451_s21, %s656_s8 }
 0x1a8   :  { %p457_p7 = pnand %p455_p6, %p452_p5 }
 0x1aa   :  { %460 = shalt.err (!%p457_p7)
}
 0x1ab   :  { %347 = dma.vmem_to_hbm [thread:$0]  %s345_s13, 16, %s656_s8, [#allocation7]   ;;  %v325_v19 = vmul.f32 %v391_v18, %v324_v16 }
 0x1ac   :  { %s461_s26 = scalar_lea.vmem %s335_s17, 16  ;;  %s465_s27 = scalar_lea.vmem %s335_s17, 32 }
 0x1ad   :  { %326 = vst [vmem:[#allocation4] sm:$0x1] %v325_v19  ;;  %p462_p8 = scmp.ne.s32.totalorder %s335_s17, %s461_s26  ;;  %p466_p9 = scmp.lt.s32.totalorder %s335_s17, %s335_s17 }
 0x1ae   :  { %p467_p10 = scmp.lt.s32.totalorder %s465_s27, %s461_s26 }
 0x1b0   :  { %p468_p11 = por %p467_p10, %p466_p9 }
 0x1b2   :  { %p469_p12 = pnand %p468_p11, %p462_p8 }
 0x1b4   :  { %472 = shalt.err (!%p469_p12)
}
 0x1b5   :  { %s473_s4 = scalar_lea.hbm %s655_s7, 16 }
 0x1b6   :  { %p474_p13 = scmp.ne.s32.totalorder %s655_s7, %s473_s4  ;;  %p477_p0 = scmp.lt.u32.totalorder %s473_s4, %s655_s7 }
 0x1b8   :  { %p479_p1 = pnand %p477_p0, %p474_p13 }
 0x1ba   :  { %482 = shalt.err (!%p479_p1)
}
 0x1bb   :  { %337 = dma.vmem_to_hbm [thread:$0]  %s335_s17, 16, %s655_s7, [#allocation5]  }
 0x1bc   :  { %483 = dma.done.wait [#allocation5], 16  }
 0x1bd   :  { %484 = vsyncadd [#allocation5], 4294967280 }
 0x1be   :  { %485 = dma.done.wait [#allocation7], 16  }
 0x1bf   :  { %486 = vsyncadd [#allocation7], 4294967280 }
 0x1c0   :  { %354 = vsyncpa [#allocation5], 1 }
 0x1c1   :  { %355 = vsyncpa [#allocation7], 1 }

</bundles_post_ra>
